<compile_context>
chip_gen: v5e
topology: v5e:2x2
jax: 0.10.0
libtpu: 0.0.40
codegen_flags: <defaults>
</compile_context>

<pallas_src>
import functools

import jax
import jax.numpy as jnp
from jax import lax
from jax.experimental import pallas as pl
from jax.experimental.pallas import tpu as pltpu


def _tversky_partial_kernel(y_pred_ref, y_true_ref, out_ref, acc_t_ref, acc_g_ref,
                            *, spatial, block_spatial, t_per_chunk, num_tiles,
                            needs_mask, has_oob_tiles):
    """Grid = (N, P, T).

    y_pred_ref: (1, C, TS)    VMEM tile of predictions (native dtype)
    y_true_ref: (1, 1, TS)    VMEM tile of float class indices
    out_ref:    (1, 1, 8, 128) per-(image, chunk) partial sums
                               (row 0: sum(y_true), row 1: sum(y_pred@true))
    acc_t_ref:  (1, TS) f32 running sum of y_true values
    acc_g_ref:  (1, TS) f32 running sum of y_pred gathered at the true class
    """
    p = pl.program_id(1)
    t = pl.program_id(2)
    global_t = p * t_per_chunk + t

    @pl.when(t == 0)
    def _():
        acc_t_ref[...] = jnp.zeros_like(acc_t_ref)
        acc_g_ref[...] = jnp.zeros_like(acc_g_ref)

    yp = y_pred_ref[0]                                   # (C, TS)
    yt = y_true_ref[0]                                   # (1, TS) class ids
    cls = lax.broadcasted_iota(jnp.int32, yp.shape, 0)   # (C, TS)

    def accumulate(valid):
        if valid is None:
            yt_vals = yt.astype(jnp.float32)
            match = cls == yt.astype(jnp.int32)
        else:
            # Sanitize out-of-range lanes BEFORE the float->int cast.
            yt_safe = jnp.where(valid, yt, jnp.zeros_like(yt))
            yt_vals = yt_safe.astype(jnp.float32)
            match = jnp.logical_and(cls == yt_safe.astype(jnp.int32), valid)
        # Collapse the class axis here: one (1, TS) row per tile instead of a
        # (C, TS) accumulator.  Pure VPU/XLU work hidden under DMA slack.
        sel = jnp.sum(jnp.where(match, yp.astype(jnp.float32), 0.0),
                      axis=0, keepdims=True)             # (1, TS)
        acc_t_ref[...] += yt_vals
        acc_g_ref[...] += sel

    in_range = (global_t < num_tiles) if has_oob_tiles else None

    if needs_mask:
        is_tail = global_t == num_tiles - 1
        steady = jnp.logical_not(is_tail)
        if in_range is not None:
            steady = jnp.logical_and(steady, in_range)

        @pl.when(steady)
        def _():
            accumulate(None)             # mask-free steady state

        @pl.when(is_tail)
        def _():
            col = lax.broadcasted_iota(jnp.int32, (1, block_spatial), 1)
            valid = (global_t * block_spatial + col) < spatial
            accumulate(valid)            # masked tail tile only
    else:
        if in_range is None:
            accumulate(None)
        else:
            @pl.when(in_range)
            def _():
                accumulate(None)

    @pl.when(t == pl.num_programs(2) - 1)
    def _():
        t_sum = jnp.sum(acc_t_ref[...])  # sum of y_true values (this chunk)
        g_sum = jnp.sum(acc_g_ref[...])  # sum of y_pred at the true class
        row = lax.broadcasted_iota(jnp.int32, out_ref.shape, 2)
        out_ref[...] = jnp.where(row == 0, t_sum,
                                 jnp.where(row == 1, g_sum, 0.0))


def tversky_loss(y_pred, y_true, *, alpha, beta, eps, n_classes,
                 max_block_spatial=131072):
    """y_pred: (N, C, H, W) float; y_true: (N, 1, H, W) float class ids."""
    N, C, H, W = y_pred.shape
    assert C == n_classes
    assert y_true.shape == (N, 1, H, W)
    S = H * W
    M = N * S  # total pixel count == sum(one_hot), assuming valid labels

    # Free, contiguous reshapes -- no transpose, no dtype upcast in HBM.
    pred = y_pred.reshape(N, C, S)
    true = y_true.reshape(N, 1, S)

    # --- generation-aware VMEM budget --------------------------------------
    try:
        vmem_physical = int(pltpu.get_tpu_info().vmem_capacity_bytes)
    except Exception:
        vmem_physical = 64 * 1024 * 1024          # conservative (v7x per-TC)
    vmem_budget = min((vmem_physical * 3) // 4, 96 * 1024 * 1024)

    pred_bpe = jnp.dtype(y_pred.dtype).itemsize
    true_bpe = jnp.dtype(y_true.dtype).itemsize
    # 2x double-buffered inputs + two (1, TS) f32 accumulators, per lane.
    per_lane_bytes = 2 * (C * pred_bpe + true_bpe) + 2 * 4
    ts_cap = (vmem_budget // per_lane_bytes) // 128 * 128
    ts_cap = max(128, min(int(max_block_spatial), ts_cap))

    if S <= ts_cap:
        TS = S                       # one full-width block (always layout-legal)
        needs_mask = False
    else:
        TS = ts_cap                  # multiple of 128
        needs_mask = (S % TS) != 0
        if needs_mask and S % 128 == 0:
            # Prefer a slightly smaller tile that divides S exactly (no tail).
            for cand in range(ts_cap, max(ts_cap // 2 - 1, 0), -128):
                if cand > 0 and S % cand == 0:
                    TS, needs_mask = cand, False
                    break
    num_tiles = pl.cdiv(S, TS)

    # --- megacore: guarantee a parallel extent >= 2 when N == 1 ------------
    P = 2 if (N == 1 and num_tiles >= 2) else 1
    t_per_chunk = pl.cdiv(num_tiles, P)
    has_oob_tiles = P * t_per_chunk > num_tiles

    if has_oob_tiles:
        def spatial_idx(p, t):
            # Clamp overhanging chunk tiles; the kernel gates them off.
            return jnp.minimum(p * t_per_chunk + t, num_tiles - 1)
    else:
        def spatial_idx(p, t):
            return p * t_per_chunk + t

    kernel = functools.partial(
        _tversky_partial_kernel,
        spatial=S, block_spatial=TS, t_per_chunk=t_per_chunk,
        num_tiles=num_tiles, needs_mask=needs_mask, has_oob_tiles=has_oob_tiles)

    partials = pl.pallas_call(
        kernel,
        out_shape=jax.ShapeDtypeStruct((N, P, 8, 128), jnp.float32),
        grid_spec=pltpu.PrefetchScalarGridSpec(
            num_scalar_prefetch=0,
            grid=(N, P, t_per_chunk),
            in_specs=[
                pl.BlockSpec((1, C, TS), lambda n, p, t: (n, 0, spatial_idx(p, t))),
                pl.BlockSpec((1, 1, TS), lambda n, p, t: (n, 0, spatial_idx(p, t))),
            ],
            out_specs=pl.BlockSpec((1, 1, 8, 128), lambda n, p, t: (n, p, 0, 0)),
            scratch_shapes=[
                pltpu.VMEM((1, TS), jnp.float32),   # acc: y_true values
                pltpu.VMEM((1, TS), jnp.float32),   # acc: y_pred at true class
            ],
        ),
        compiler_params=pltpu.CompilerParams(
            dimension_semantics=("parallel", "parallel", "arbitrary"),
            vmem_limit_bytes=int(vmem_budget),
        ),
    )(pred, true)

    # Tiny cross-chunk combine + scalar Tversky formula (exact algebraic
    # equivalent of the original tp/fp/fn sums).
    t_sum = jnp.sum(partials[:, :, 0, 0])          # sum(y_true * one_hot)
    g_sum = jnp.sum(partials[:, :, 1, 0])          # sum(y_pred * one_hot)
    tp = t_sum
    fp = alpha * (C - 1) * t_sum                   # sum(y_true * (1 - one_hot))
    fn = beta * (float(M) - g_sum)                 # sum((1 - y_pred) * one_hot)
    score = tp / (tp + fp + fn + eps)
    return 1.0 - score


if __name__ == "__main__":
    # Deterministic "module parameters" (from __init__ signature).
    alpha, beta, eps, n_classes = 0.3, 0.7, 1e-6, 4

    key = jax.random.PRNGKey(0)
    k1, k2, k3, k4, k5, k6 = jax.random.split(key, 6)

    def reference(y_pred, y_true):
        # Pure-JAX transcription of the PyTorch forward (identical semantics).
        C = y_pred.shape[1]
        one_hot = (jnp.arange(C, dtype=jnp.int32)[None, :, None, None]
                   == y_true.astype(jnp.int32)).astype(jnp.float32)
        p0 = y_true
        p1 = 1.0 - y_pred
        g0 = one_hot
        g1 = 1.0 - one_hot
        tp = jnp.sum(p0 * g0)
        fp = alpha * jnp.sum(p0 * g1)
        fn = beta * jnp.sum(p1 * g0)
        return 1.0 - tp / (tp + fp + fn + eps)

    # Case 1: standard NCHW shapes, single full-width spatial block per image.
    N, C, H, W = 2, n_classes, 16, 16
    y_pred = jax.nn.softmax(jax.random.normal(k1, (N, C, H, W), jnp.float32), axis=1)
    y_true = jax.random.randint(k2, (N, 1, H, W), 0, C).astype(jnp.float32)
    loss = tversky_loss(y_pred, y_true, alpha=alpha, beta=beta, eps=eps,
                        n_classes=n_classes)
    loss = jax.block_until_ready(loss)
    ref = reference(y_pred, y_true)
    assert abs(float(loss) - float(ref)) < 1e-4, (float(loss), float(ref))

    # Case 2: spatial size not a multiple of the tile (small cap forces two
    # spatial tiles with a masked tail) -- exercises the tail-only mask path.
    H2, W2 = 15, 16
    y_pred2 = jax.nn.softmax(jax.random.normal(k3, (N, C, H2, W2), jnp.float32), axis=1)
    y_true2 = jax.random.randint(k4, (N, 1, H2, W2), 0, C).astype(jnp.float32)
    loss2 = tversky_loss(y_pred2, y_true2, alpha=alpha, beta=beta, eps=eps,
                         n_classes=n_classes, max_block_spatial=128)
    loss2 = jax.block_until_ready(loss2)
    ref2 = reference(y_pred2, y_true2)
    assert abs(float(loss2) - float(ref2)) < 1e-4, (float(loss2), float(ref2))

    # Case 3: N == 1 with an odd tile count -- exercises the P=2 megacore
    # split, the clamped/gated overhang tile, AND the masked tail tile.
    H3, W3 = 15, 24   # S = 360 -> 3 tiles of 128, split into 2 chunks of 2
    y_pred3 = jax.nn.softmax(jax.random.normal(k5, (1, C, H3, W3), jnp.float32), axis=1)
    y_true3 = jax.random.randint(k6, (1, 1, H3, W3), 0, C).astype(jnp.float32)
    loss3 = tversky_loss(y_pred3, y_true3, alpha=alpha, beta=beta, eps=eps,
                         n_classes=n_classes, max_block_spatial=128)
    loss3 = jax.block_until_ready(loss3)
    ref3 = reference(y_pred3, y_true3)
    assert abs(float(loss3) - float(ref3)) < 1e-4, (float(loss3), float(ref3))

    print("KERNEL_OK")
</pallas_src>

<mosaic_0001>
module attributes {stable_mosaic.version = 11 : i64} {
  func.func @_tversky_partial_kernel(%arg0: i32, %arg1: i32, %arg2: i32, %arg3: memref<1x4x256xf32, #tpu.memory_space<vmem>>, %arg4: memref<1x1x256xf32, #tpu.memory_space<vmem>>, %arg5: memref<1x1x8x128xf32, #tpu.memory_space<vmem>>, %arg6: memref<1x256xf32, #tpu.memory_space<vmem>>, %arg7: memref<1x256xf32, #tpu.memory_space<vmem>>) attributes {dimension_semantics = [#tpu.dimension_semantics<parallel>, #tpu.dimension_semantics<parallel>, #tpu.dimension_semantics<arbitrary>], iteration_bounds = array<i64: 2, 1, 1>, scalar_prefetch = 0 : i64, scratch_operands = 2 : i64, tpu.core_type = #tpu.core_type<tc>, window_params = [{transform_indices = @transform_0, window_bounds = array<i64: 1, 4, 256>}, {transform_indices = @transform_1, window_bounds = array<i64: 1, 1, 256>}, {transform_indices = @transform_2, window_bounds = array<i64: 1, 1, 8, 128>}]} {
    %c0_i32 = arith.constant 0 : i32
    %0 = arith.cmpi eq, %arg2, %c0_i32 : i32
    %1 = arith.extui %0 : i1 to i32
    %c0_i32_0 = arith.constant 0 : i32
    %2 = arith.cmpi ne, %1, %c0_i32_0 : i32
    scf.if %2 {
      %cst_17 = arith.constant 0.000000e+00 : f32
      %24 = vector.broadcast %cst_17 : f32 to vector<1x256xf32>
      %c0_18 = arith.constant 0 : index
      %c0_19 = arith.constant 0 : index
      %25 = vector.load %arg6[%c0_18, %c0_19] : memref<1x256xf32, #tpu.memory_space<vmem>>, vector<1x256xf32>
      tpu.vector_store %arg6[%c0_18, %c0_19], %24 {strides = array<i32>} : memref<1x256xf32, #tpu.memory_space<vmem>>, vector<1x256xf32>,
      %cst_20 = arith.constant 0.000000e+00 : f32
      %26 = vector.broadcast %cst_20 : f32 to vector<1x256xf32>
      %c0_21 = arith.constant 0 : index
      %c0_22 = arith.constant 0 : index
      %27 = vector.load %arg7[%c0_21, %c0_22] : memref<1x256xf32, #tpu.memory_space<vmem>>, vector<1x256xf32>
      tpu.vector_store %arg7[%c0_21, %c0_22], %26 {strides = array<i32>} : memref<1x256xf32, #tpu.memory_space<vmem>>, vector<1x256xf32>,
    } else {
    }
    %c0 = arith.constant 0 : index
    %c0_1 = arith.constant 0 : index
    %c0_2 = arith.constant 0 : index
    %3 = vector.load %arg3[%c0, %c0_1, %c0_2] : memref<1x4x256xf32, #tpu.memory_space<vmem>>, vector<1x4x256xf32>
    %4 = vector.shape_cast %3 : vector<1x4x256xf32> to vector<4x256xf32>
    %c0_3 = arith.constant 0 : index
    %c0_4 = arith.constant 0 : index
    %c0_5 = arith.constant 0 : index
    %5 = vector.load %arg4[%c0_3, %c0_4, %c0_5] : memref<1x1x256xf32, #tpu.memory_space<vmem>>, vector<1x1x256xf32>
    %6 = vector.shape_cast %5 : vector<1x1x256xf32> to vector<1x256xf32>
    %7 = tpu.iota {dimensions = array<i32: 0>} : vector<4x256xi32>
    %8 = arith.fptosi %6 : vector<1x256xf32> to vector<1x256xi32>
    %9 = vector.broadcast %8 : vector<1x256xi32> to vector<4x256xi32>
    %10 = arith.cmpi eq, %7, %9 : vector<4x256xi32>
    %cst = arith.constant 0.000000e+00 : f32
    %11 = vector.broadcast %cst : f32 to vector<4x256xf32>
    %12 = arith.select %10, %4, %11 : vector<4x256xi1>, vector<4x256xf32>
    %cst_6 = arith.constant dense<0.000000e+00> : vector<256xf32>
    %13 = vector.multi_reduction <add>, %12, %cst_6 [0] : vector<4x256xf32> to vector<256xf32>
    %14 = vector.shape_cast %13 : vector<256xf32> to vector<1x256xf32>
    %c0_7 = arith.constant 0 : index
    %c0_8 = arith.constant 0 : index
    %15 = vector.load %arg6[%c0_7, %c0_8] : memref<1x256xf32, #tpu.memory_space<vmem>>, vector<1x256xf32>
    %16 = arith.addf %15, %6 : vector<1x256xf32>
    %c0_9 = arith.constant 0 : index
    %c0_10 = arith.constant 0 : index
    %17 = vector.load %arg6[%c0_9, %c0_10] : memref<1x256xf32, #tpu.memory_space<vmem>>, vector<1x256xf32>
    tpu.vector_store %arg6[%c0_9, %c0_10], %16 {strides = array<i32>} : memref<1x256xf32, #tpu.memory_space<vmem>>, vector<1x256xf32>,
    %c0_11 = arith.constant 0 : index
    %c0_12 = arith.constant 0 : index
    %18 = vector.load %arg7[%c0_11, %c0_12] : memref<1x256xf32, #tpu.memory_space<vmem>>, vector<1x256xf32>
    %19 = arith.addf %18, %14 : vector<1x256xf32>
    %c0_13 = arith.constant 0 : index
    %c0_14 = arith.constant 0 : index
    %20 = vector.load %arg7[%c0_13, %c0_14] : memref<1x256xf32, #tpu.memory_space<vmem>>, vector<1x256xf32>
    tpu.vector_store %arg7[%c0_13, %c0_14], %19 {strides = array<i32>} : memref<1x256xf32, #tpu.memory_space<vmem>>, vector<1x256xf32>,
    %c0_i32_15 = arith.constant 0 : i32
    %21 = arith.cmpi eq, %arg2, %c0_i32_15 : i32
    %22 = arith.extui %21 : i1 to i32
    %c0_i32_16 = arith.constant 0 : i32
    %23 = arith.cmpi ne, %22, %c0_i32_16 : i32
    scf.if %23 {
      %c0_17 = arith.constant 0 : index
      %c0_18 = arith.constant 0 : index
      %24 = vector.load %arg6[%c0_17, %c0_18] : memref<1x256xf32, #tpu.memory_space<vmem>>, vector<1x256xf32>
      %25 = vector.shape_cast %24 : vector<1x256xf32> to vector<1x1x256xf32>
      %cst_19 = arith.constant dense<0.000000e+00> : vector<1xf32>
      %26 = vector.multi_reduction <add>, %25, %cst_19 [1, 2] : vector<1x1x256xf32> to vector<1xf32>
      %27 = vector.shape_cast %26 : vector<1xf32> to vector<1x1x1xf32>
      %28 = vector.extract %27[0, 0, 0] : f32 from vector<1x1x1xf32>
      %c0_20 = arith.constant 0 : index
      %c0_21 = arith.constant 0 : index
      %29 = vector.load %arg7[%c0_20, %c0_21] : memref<1x256xf32, #tpu.memory_space<vmem>>, vector<1x256xf32>
      %30 = vector.shape_cast %29 : vector<1x256xf32> to vector<1x1x256xf32>
      %cst_22 = arith.constant dense<0.000000e+00> : vector<1xf32>
      %31 = vector.multi_reduction <add>, %30, %cst_22 [1, 2] : vector<1x1x256xf32> to vector<1xf32>
      %32 = vector.shape_cast %31 : vector<1xf32> to vector<1x1x1xf32>
      %33 = vector.extract %32[0, 0, 0] : f32 from vector<1x1x1xf32>
      %34 = tpu.iota {dimensions = array<i32: 2>} : vector<1x1x8x128xi32>
      %c0_i32_23 = arith.constant 0 : i32
      %35 = vector.broadcast %c0_i32_23 : i32 to vector<1x1x8x128xi32>
      %36 = arith.cmpi eq, %34, %35 : vector<1x1x8x128xi32>
      %c1_i32 = arith.constant 1 : i32
      %37 = vector.broadcast %c1_i32 : i32 to vector<1x1x8x128xi32>
      %38 = arith.cmpi eq, %34, %37 : vector<1x1x8x128xi32>
      %cst_24 = arith.constant 0.000000e+00 : f32
      %39 = vector.broadcast %33 : f32 to vector<1x1x8x128xf32>
      %40 = vector.broadcast %cst_24 : f32 to vector<1x1x8x128xf32>
      %41 = arith.select %38, %39, %40 : vector<1x1x8x128xi1>, vector<1x1x8x128xf32>
      %42 = vector.broadcast %28 : f32 to vector<1x1x8x128xf32>
      %43 = arith.select %36, %42, %41 : vector<1x1x8x128xi1>, vector<1x1x8x128xf32>
      %c0_25 = arith.constant 0 : index
      %c0_26 = arith.constant 0 : index
      %c0_27 = arith.constant 0 : index
      %c0_28 = arith.constant 0 : index
      %44 = vector.load %arg5[%c0_25, %c0_26, %c0_27, %c0_28] : memref<1x1x8x128xf32, #tpu.memory_space<vmem>>, vector<1x1x8x128xf32>
      tpu.vector_store %arg5[%c0_25, %c0_26, %c0_27, %c0_28], %43 {strides = array<i32>} : memref<1x1x8x128xf32, #tpu.memory_space<vmem>>, vector<1x1x8x128xf32>,
    } else {
    }
    return
  }
  func.func @transform_0(%arg0: i32, %arg1: i32, %arg2: i32) -> (i32, i32, i32) {
    %c1_i32 = arith.constant 1 : i32
    %0 = arith.muli %arg1, %c1_i32 : i32
    %1 = arith.addi %0, %arg2 : i32
    %c0_i32 = arith.constant 0 : i32
    %c0_i32_0 = arith.constant 0 : i32
    return %arg0, %c0_i32, %1 : i32, i32, i32
  }
  func.func @transform_1(%arg0: i32, %arg1: i32, %arg2: i32) -> (i32, i32, i32) {
    %c1_i32 = arith.constant 1 : i32
    %0 = arith.muli %arg1, %c1_i32 : i32
    %1 = arith.addi %0, %arg2 : i32
    %c0_i32 = arith.constant 0 : i32
    %c0_i32_0 = arith.constant 0 : i32
    return %arg0, %c0_i32, %1 : i32, i32, i32
  }
  func.func @transform_2(%arg0: i32, %arg1: i32, %arg2: i32) -> (i32, i32, i32, i32) {
    %c0_i32 = arith.constant 0 : i32
    %c0_i32_0 = arith.constant 0 : i32
    %c0_i32_1 = arith.constant 0 : i32
    return %arg0, %arg1, %c0_i32, %c0_i32_0 : i32, i32, i32, i32
  }
}

</mosaic_0001>

<bundles_post_ra>
// kernel: tpu_custom_call.1
= control target key start
LH: loop header
LB: loop body
LE: loop exit
PB: predicated region body
PF: predicated region fallthrough
CT: control target
= control target key end

     0   :  { %7 = vsyncpa [#allocation5], 0  ;;  %s897_s0 = inlined_call_operand.hbm [shape: f32[2,4,256], index: 0, kind: input, shape index: {}]   ;;  %s898_s1 = inlined_call_operand.hbm [shape: f32[2,1,256], index: 1, kind: input, shape index: {}]   ;;  %s899_s2 = inlined_call_operand.hbm [shape: f32[2,1,8,128], index: 2, kind: output, shape index: {}]  }
   0x1   :  { %9 = vsyncpa [#allocation5 + $0x1], 0 }
   0x2   :  { %10 = vsyncpa [#allocation8], 0 }
   0x3   :  { %12 = vsyncpa [#allocation8 + $0x1], 0 }
   0x4   :  { %13 = vsyncpa [#allocation6], 0 }
   0x5   :  { %15 = vsyncpa [#allocation6 + $0x1], 0  ;;  %s732_s9 = smov 0   ;;  %s734_s10 = smov 0  }
   0x6   :  { %s736_s11 = smov 0   ;;  %s738_s12 = smov 0  }
   0x7   :  { %s740_s13 = smov 0   ;;  %s742_s14 = smov 0  }
   0x8 LB: > { %s473_s15 = sadd.s32 4294967295, %s714_s14   ;;  %s474_s16 = sadd.s32 4294967294, %s714_s14   ;;  %s714_s14 = sphi %s742_s14, %s21_s14   ;;  %s710_s13 = sphi %s740_s13, %s911_s13   ;;  %s706_s12 = sphi %s738_s12, %s910_s12   ;;  %s702_s11 = sphi %s736_s11, %s909_s11   ;;  %s698_s10 = sphi %s734_s10, %s908_s10   ;;  %s694_s9 = sphi %s732_s9, %s907_s9  }
   0x9   : > { %s40_s17 = sadd.s32 1, %s710_s13  ;;  %s51_s18 = sadd.s32 1, %s702_s11 }
   0xa   : > { %p42_p0 = scmp.ge.s32.totalorder %s40_s17, 2  ;;  %p58_p1 = scmp.ne.s32.totalorder %s702_s11, %s698_s10 }
   0xb   : > { %p59_p2 = scmp.eq.s32.totalorder %s714_s14, 0  ;;  %p64_p3 = scmp.ne.s32.totalorder %s698_s10, %s694_s9 }
   0xc   : > { %s913_s17 = smov (%p42_p0, %s40_s17), 0  ;;  %p65_p5 = scmp.eq.s32.totalorder %s473_s15, 0 }
   0xd   : > { %p773_p4 = por %p59_p2, %p58_p1  ;;  %s46_s20 = ssub.s32 %s710_s13, %s913_s17 }
   0xe   : > { %p120_p6 = scmp.eq.s32.totalorder %s473_s15, 1  ;;  %p49_p7 = scmp.eq.s32.totalorder %s46_s20, 0 }
   0xf   : > { %p779_p8 = por %p65_p5, %p64_p3  ;;  %p126_p10 = scmp.eq.s32.totalorder %s474_s16, 1 }
  0x10   : > { %p783_p9 = por %p120_p6, %p58_p1  ;;  %p476_p12 = scmp.ge.s32.totalorder %s714_s14, 2 }
  0x11   : > { %s788_s23 = scalar_select %p49_p7, %s702_s11, %s51_s18  }
  0x12   : > { %p790_p11 = por %p126_p10, %p64_p3  ;;  %p517_p13 = scmp.lt.s32.totalorder %s714_s14, 2 }
  0x13   : > { %s146_s25 = sand.u32 1, %s702_s11   ;;  %s490_s27 = sshll.u32 %s710_s13, 3 }
  0x14   : > { %s477_s26 = sshll.u32 %s146_s25, 3  ;;  %s158_s30 = scalar_lea.hbm %s897_s0, %s490_s27 }
  0x15   : > { %s150_s3 = scalar_lea.vmem [#allocation4], %s477_s26  ;;  %s160_s5 = sshll.u32 %s158_s30, 4  ;;  %s161_s5 = int_to_ptr.hbm [resolvable:$true] %s160_s5 }
  0x16   : > { %s162_s4 = sshll.u32 %s150_s3, 4  ;;  %p803_p0 = pnand %p517_p13, %p773_p4  ;;  %s163_s4 = int_to_ptr.vmem [resolvable:$true] %s162_s4 }
  0x17   : > { %p482_p1 = scmp.ge.s32.totalorder %s714_s14, 1  ;;  %p189_p2 = scmp.lt.s32.totalorder %s714_s14, 3 }
  0x18   : > { %s147_s7 = scalar_lea.sflag [#allocation5], %s146_s25  ;;  %s480_s8 = sshll.u32 %s146_s25, 1 }
  0x19   : > { %509 = dma.hbm_to_vmem [thread:$0]  (!%p803_p0), %s161_s5, 128, %s163_s4, %s147_s7  }
  0x1a   : > { %p190_p3 = pnand %p482_p1, %p189_p2  ;;  %s481_s15 = sshll.u32 %s710_s13, 1 }
  0x1b   : > { %s180_s20 = scalar_lea.hbm %s898_s1, %s481_s15  ;;  %s173_s26 = scalar_lea.vmem [#allocation7], %s480_s8 }
  0x1c   : > { %s184_s19 = sshll.u32 %s173_s26, 4  ;;  %s182_s27 = sshll.u32 %s180_s20, 4  ;;  %s185_s19 = int_to_ptr.vmem [resolvable:$true] %s184_s19  ;;  %s183_s27 = int_to_ptr.hbm [resolvable:$true] %s182_s27 }
  0x1d   : > { %s170_s28 = scalar_lea.sflag [#allocation8], %s146_s25  ;;  %193 = sbr.rel (%p190_p3) target bundleno = 263 (0x107), region = 28 }
  0x1e   : > { %512 = dma.hbm_to_vmem [thread:$0]  (!%p803_p0), %s183_s27, 32, %s185_s19, %s170_s28  }
  0x1f   : > { %s818_s29 = sand.u32 (!%p190_p3), 1, %s698_s10  }
  0x20   : > { %s483_s30 = sshll.u32 (!%p190_p3), %s818_s29, 3  ;;  %s196_s3 = scalar_lea.sflag (!%p190_p3), [#allocation5], %s818_s29 }
  0x21   : > { %s199_s4 = scalar_lea.vmem (!%p190_p3), [#allocation4], %s483_s30 }
  0x22   : > { %681 = dma.done.wait (%p779_p8), %s196_s3, 128  }
  0x23   : > { %683 = vsyncadd (%p779_p8), %s196_s3, 4294967168  ;;  %s484_s25 = sshll.u32 %s818_s29, 1  ;;  %s206_s5 = scalar_lea.sflag [#allocation8], %s818_s29 }
  0x24   : > { %s209_s6 = scalar_lea.vmem [#allocation7], %s484_s25 }
  0x25   : > { %685 = dma.done.wait (%p779_p8), %s206_s5, 32  }
  0x26   : > { %687 = vsyncadd (%p779_p8), %s206_s5, 4294967264  ;;  %v244_v0 = vlaneseq  ;;  %v716_v2 = vmov 0.0   ;;  %v250_v3 = vld [vmem:[%s199_s4] sm:$0xff]  ;;  %v251_v4 = vld [vmem:[%s209_s6] sm:$0x3]  ;;  %vm267_vm2 = vcmask 1043456  }
  0x27   : > { %260 = vst [vmem:[#allocation1] ss:$2 sm:$0xff] %v250_v3  ;;  %vm491_vm1 = vcmp.lt.s32.totalorder %v251_v4, 0  ;;  %v492_v5 = vceil.f32 %v251_v4  ;;  %v493_v6 = vfloor.f32 %v251_v4  ;;  %vm293_vm5 = vcmask 1040384   ;;  %s487_s21 = sshll.u32 %s706_s12, 3  ;;  %s235_s16 = scalar_lea.vmem [#allocation9], %s483_s30 }
  0x28   : > { %vm834_vm0 = vcmp.lt.s32.totalorder %v244_v0, 256  ;;  %v842_v9 = vshrl.u32 %v244_v0, 7  ;;  %s356_s15 = scalar_lea.hbm %s899_s2, %s487_s21  ;;  %s358_s18 = sshll.u32 %s235_s16, 4  ;;  %s359_s18 = int_to_ptr.vmem [resolvable:$true] %s358_s18 }
  0x29   : > { %248 = vst.msk [vmem:[#allocation2] sm:$0x3] %vm834_vm0, %v716_v2  ;;  %v494_v7 = vsel %vm491_vm1, %v492_v5, %v493_v6  ;;  %s360_s26 = sshll.u32 %s356_s15, 4  ;;  %s345_s12 = scalar_lea.sflag [#allocation6], %s818_s29  ;;  %s361_s26 = int_to_ptr.hbm [resolvable:$true] %s360_s26 }
  0x2a   : > { %249 = vst.msk [vmem:[#allocation3] sm:$0x3] %vm834_vm0, %v716_v2  ;;  %v495_v10 = vcvt.f32.s32 %v494_v7  ;;  %vm338_vm6 = vcmp.eq.s32.totalorder %v842_v9, 1  ;;  %vm337_vm7 = vcmp.eq.s32.totalorder %v842_v9, 0  ;;  %s642_s27 = sshra.s32 %s361_s26, 4  ;;  %s648_s4 = scalar_lea.hbm %s899_s2, 16  ;;  %s643_s27 = int_to_ptr.hbm [resolvable:$true] %s642_s27 }
  0x2b   : > { %s644_s28 = scalar_lea.hbm %s643_s27, 8  ;;  %p649_p7 = scmp.lt.s32.totalorder %s643_s27, %s899_s2 }
  0x2c   : > { %v255_v12 = vperm.slane %v495_v10, 0  ;;  %v256_v13 = vperm.slane %v495_v10, 1  ;;  %p645_p4 = scmp.ne.s32.totalorder %s643_s27, %s644_s28  ;;  %p650_p8 = scmp.lt.s32.totalorder %s648_s4, %s644_s28 }
  0x2e   : > { %vm257_vm3 = vcmp.eq.s32.totalorder %v842_v9, %v255_v12  ;;  %vm258_vm4 = vcmp.eq.s32.totalorder %v842_v9, %v256_v13  ;;  %v261_v14 = vld.sshfl [vmem:[#allocation1] sm:$0xff pattern:$0x75316420]  ;;  %v262_v15 = vld.sshfl [vmem:[#allocation1 + $0x8] sm:$0xff pattern:$0x75316420]  ;;  %p646_p5 = pnand %p645_p4, %p783_p9  ;;  %p651_p10 = por %p650_p8, %p649_p7 }
  0x2f   : > { %v265_v16 = vsel %vm257_vm3, %v261_v14, 0.0  ;;  %v266_v17 = vsel %vm258_vm4, %v262_v15, 0.0 }
  0x30   : > { %v282_v8 = vld [vmem:[#allocation2] sm:$0x3]  ;;  %v268_v18 = vsel %vm267_vm2, %v265_v16, 0.0  ;;  %v275_v19 = vsel %vm267_vm2, %v266_v17, 0.0  ;;  %p647_p6 = pneg %p646_p5 }
  0x31   : > { %v283_v11 = vadd.f32 %v282_v8, %v251_v4  ;;  %v269_v20 = vrot.slane %v268_v18, 4  ;;  %v276_v21 = vrot.slane %v275_v19, 4  ;;  %v289_v38 = vld [vmem:[#allocation3] sm:$0x3] }
  0x32   : > { %p652_p13 = pnand %p651_p10, %p647_p6 }
  0x33   : > { %288 = vst.msk [vmem:[#allocation2] sm:$0x3] %vm834_vm0, %v283_v11  ;;  %v270_v22 = vadd.f32 %v269_v20, %v268_v18  ;;  %v277_v23 = vadd.f32 %v276_v21, %v275_v19 }
  0x35   : > { %v271_v27 = vrot.slane %v270_v22, 2  ;;  %v278_v28 = vrot.slane %v277_v23, 2 }
  0x37   : > { %v272_v31 = vadd.f32 %v271_v27, %v270_v22  ;;  %v279_v32 = vadd.f32 %v278_v28, %v277_v23 }
  0x39   : > { %v273_v34 = vrot.slane %v272_v31, 1  ;;  %v280_v35 = vrot.slane %v279_v32, 1 }
  0x3a   : > { %v301_v24 = vld [vmem:[#allocation2] sm:$0x3] }
  0x3b   : > { %v303_v25 = vperm.slane %v301_v24, 0  ;;  %v304_v26 = vperm.slane %v301_v24, 1  ;;  %v274_v36 = vadd.f32 %v273_v34, %v272_v31  ;;  %v281_v37 = vadd.f32 %v280_v35, %v279_v32 }
  0x3d   : > { %v307_v29 = vsel %vm293_vm5, %v303_v25, 0.0  ;;  %v308_v30 = vsel %vm293_vm5, %v304_v26, 0.0  ;;  %v292_v39 = vrot.slane %v281_v37, 7 }
  0x3e   : > { %v309_v33 = vadd.f32 %v308_v30, %v307_v29 }
  0x3f   : > { %v294_v40 = vsel %vm293_vm5, %v274_v36, %v292_v39 }
  0x40   : > { %310 = vadd.xlane.f32.xlu0 %v309_v33  ;;  %v296_v41 = vadd.f32 %v294_v40, %v289_v38 }
  0x42   : > { %297 = vst.msk [vmem:[#allocation3] sm:$0x3] %vm834_vm0, %v296_v41 }
  0x49   : > { %v319_v42 = vld [vmem:[#allocation3] sm:$0x3] }
  0x4a   : > { %v321_v43 = vperm.slane %v319_v42, 0  ;;  %v322_v44 = vperm.slane %v319_v42, 1 }
  0x4c   : > { %v325_v45 = vsel %vm293_vm5, %v321_v43, 0.0  ;;  %v326_v46 = vsel %vm293_vm5, %v322_v44, 0.0 }
  0x4d   : > { %v327_v47 = vadd.f32 %v326_v46, %v325_v45 }
  0x4f   : > { %328 = vadd.xlane.f32.xlu0 %v327_v47 }
  0xb3   : > { %v311_v48 = vpop.xlane.xlu0 %310 }
  0xb4   : > { %v312_v49 = vrot.slane %v311_v48, 4 }
  0xb6   : > { %v313_v50 = vadd.f32 %v312_v49, %v311_v48 }
  0xb8   : > { %v314_v51 = vrot.slane %v313_v50, 2 }
  0xba   : > { %v315_v52 = vadd.f32 %v314_v51, %v313_v50 }
  0xbc   : > { %v316_v53 = vrot.slane %v315_v52, 1 }
  0xbe   : > { %v317_v54 = vadd.f32 %v316_v53, %v315_v52 }
  0xc0   : > { %496 = vpush %v317_v54 }
  0xc2   : > { %v329_v55 = vpop.xlane.xlu0 %328 }
  0xc3   : > { %v330_v56 = vrot.slane %v329_v55, 4 }
  0xc5   : > { %v331_v57 = vadd.f32 %v330_v56, %v329_v55 }
  0xc7   : > { %v332_v58 = vrot.slane %v331_v57, 2 }
  0xc9   : > { %v333_v59 = vadd.f32 %v332_v58, %v331_v57 }
  0xcb   : > { %v334_v60 = vrot.slane %v333_v59, 1 }
  0xcd   : > { %v335_v61 = vadd.f32 %v334_v60, %v333_v59 }
  0xcf   : > { %498 = vpush %v335_v61 }
  0xf1   : > { %s497_s20 = spop %496 }
  0xf2   : > { %v341_v63 = vstv %s497_s20 }
 0x100   : > { %s499_s19 = spop %498 }
 0x101   : > { %v339_v62 = vstv %s499_s19 }
 0x102   : > { %v340_v0 = vsel %vm338_vm6, %v339_v62, 0.0 }
 0x103   : > { %v342_v1 = vsel %vm337_vm7, %v341_v63, %v340_v0 }
 0x104   : > { %343 = vst [vmem:[%s235_s16] sm:$0xff] %v342_v1 }
 0x105   : > { %655 = shalt.err (!%p652_p13)
}
 0x106   : > { %504 = dma.vmem_to_hbm [thread:$0]  (%p783_p9), %s359_s18, 128, %s361_s26, %s345_s12  }
 0x107 PF: > { %s372_s29 = sand.u32 1, %s694_s9   ;;  %p514_p0 = pnand %p476_p12, %p790_p11 }
 0x108   : > { %s373_s6 = scalar_lea.sflag [#allocation6], %s372_s29 }
 0x109   : > { %p515_p1 = pneg %p514_p0 }
 0x10b   : > { %689 = dma.done.wait (%p515_p1), %s373_s6, 128  }
 0x10c   : > { %691 = vsyncadd (%p515_p1), %s373_s6, 4294967168  ;;  %s21_s14 = sadd.s32 1, %s714_s14   ;;  %s907_s9 = smov %s698_s10 }
 0x10d   : > { %p18_p2 = scmp.ge.s32.totalorder %s21_s14, 4   ;;  %s908_s10 = smov %s702_s11 }
 0x10e   : > { %s909_s11 = smov %s788_s23  ;;  %s910_s12 = smov %s710_s13 }
 0x10f   : > { %s911_s13 = smov %s913_s17  ;;  %20 = sbr.rel (!%p18_p2) target bundleno = 8 (0x8), region = 94 }
 0x114   :  { %379 = vsyncpa [#allocation5], 1 }
 0x115   :  { %381 = vsyncpa [#allocation5 + $0x1], 1 }
 0x116   :  { %382 = vsyncpa [#allocation8], 1 }
 0x117   :  { %384 = vsyncpa [#allocation8 + $0x1], 1 }
 0x118   :  { %385 = vsyncpa [#allocation6], 1 }
 0x119   :  { %387 = vsyncpa [#allocation6 + $0x1], 1 }

</bundles_post_ra>
